<compile_context>
chip_gen: v7x
topology: tpu7x:2x2x1
jax: 0.10.0
libtpu: 0.0.40
codegen_flags: <defaults>
</compile_context>

<pallas_src>
import functools

import jax
import jax.numpy as jnp
from jax.experimental import pallas as pl
from jax.experimental.pallas import tpu as pltpu


def _round_up(x, m):
    return (x + m - 1) // m * m


def _vmem_physical_bytes():
    """Physical VMEM of the current chip (conservative fallback: 64 MiB)."""
    try:
        info = pltpu.get_tpu_info()
        cap = getattr(info, "vmem_capacity_bytes", None)
        if cap:
            return int(cap)
    except Exception:
        pass
    return 64 * 1024 * 1024


def _make_matmul_bn_relu_kernel(multi_k):
    """GEMM + fused scale/bias/ReLU epilogue.  Scratch accumulator only if K is tiled."""
    if not multi_k:
        def kernel(lhs_ref, w_ref, scale_ref, bias_ref, o_ref):
            acc = jnp.dot(lhs_ref[...], w_ref[...],
                          preferred_element_type=jnp.float32)
            y = acc * scale_ref[...] + bias_ref[...]
            o_ref[...] = jnp.maximum(y, 0.0).astype(o_ref.dtype)
        return kernel

    def kernel(lhs_ref, w_ref, scale_ref, bias_ref, o_ref, acc_ref):
        k = pl.program_id(2)

        @pl.when(k == 0)
        def _():
            acc_ref[...] = jnp.zeros_like(acc_ref)

        acc_ref[...] += jnp.dot(lhs_ref[...], w_ref[...],
                                preferred_element_type=jnp.float32)

        @pl.when(k == pl.num_programs(2) - 1)
        def _():
            y = acc_ref[...] * scale_ref[...] + bias_ref[...]
            o_ref[...] = jnp.maximum(y, 0.0).astype(o_ref.dtype)

    return kernel


@functools.partial(
    jax.jit,
    static_argnames=("stride", "padding", "dilation", "eps", "compute_dtype"))
def conv2d_bn_relu(x, conv_w, conv_b, bn_gamma, bn_beta, bn_mean, bn_var, *,
                   stride=1, padding=0, dilation=1, eps=1e-5,
                   compute_dtype=None):
    """x: (B, C_in, H, W); conv_w: (C_out, C_in, KH, KW).  Returns (B, C_out, OH, OW)."""
    B, C_in, H, W = x.shape
    C_out, C_in_w, KH, KW = conv_w.shape
    assert C_in_w == C_in

    OH = (H + 2 * padding - dilation * (KH - 1) - 1) // stride + 1
    OW = (W + 2 * padding - dilation * (KW - 1) - 1) // stride + 1

    in_dt = jnp.dtype(compute_dtype) if compute_dtype is not None else x.dtype
    out_dt = x.dtype

    # ---- host-side (XLA) layout prep: NCHW -> NHWC, pad, im2col unfold ----
    x_nhwc = jnp.transpose(x, (0, 2, 3, 1))
    if padding > 0:
        x_nhwc = jnp.pad(
            x_nhwc, ((0, 0), (padding, padding), (padding, padding), (0, 0)))

    cols = []
    for kh in range(KH):
        for kw in range(KW):
            h0, w0 = kh * dilation, kw * dilation
            cols.append(
                x_nhwc[:, h0:h0 + (OH - 1) * stride + 1:stride,
                       w0:w0 + (OW - 1) * stride + 1:stride, :])
    # (B, OH, OW, KH*KW*C_in) -> (M, K); feature order = (kh, kw, c_in).
    lhs = jnp.concatenate(cols, axis=-1).reshape(
        B * OH * OW, KH * KW * C_in).astype(in_dt)
    # Weights: (C_out, C_in, KH, KW) -> (KH, KW, C_in, C_out) -> (K, C_out).
    w2 = jnp.transpose(conv_w, (2, 3, 1, 0)).reshape(
        KH * KW * C_in, C_out).astype(in_dt)

    # Fold conv bias + eval-mode BatchNorm into per-output-channel scale/bias.
    scale = bn_gamma.astype(jnp.float32) / jnp.sqrt(
        bn_var.astype(jnp.float32) + eps)
    if conv_b is None:
        conv_b = jnp.zeros((C_out,), jnp.float32)
    bias = bn_beta.astype(jnp.float32) + scale * (
        conv_b.astype(jnp.float32) - bn_mean.astype(jnp.float32))

    M, K, N = B * OH * OW, KH * KW * C_in, C_out

    # ---- tile selection ----
    # N: lane-dense output tiles; 256-wide when it divides evenly (one full
    # v6e/v7x MXU pass), otherwise 128 (always fine on v5e).
    Np = _round_up(N, 128)
    TN = 256 if Np % 256 == 0 else 128
    n_n = Np // TN

    # M: batch + spatial folded together; cap the tile at 512 rows.
    TM_MAX = 512
    if M <= TM_MAX:
        TM = _round_up(M, 8)
        Mp = TM
    else:
        TM = TM_MAX
        Mp = _round_up(M, TM)
    n_m = Mp // TM

    # K: single deep block when small (the common conv case); tile + VMEM
    # accumulator otherwise.
    TK_MAX = 1024
    if K <= TK_MAX:
        TK, Kp = K, K
    else:
        TK = 512
        Kp = _round_up(K, TK)
    n_k = Kp // TK

    # Zero-pad operands to the tiled shapes (zeros add nothing to the
    # contraction; padded output rows/cols are sliced away below).
    lhs = jnp.pad(lhs, ((0, Mp - M), (0, Kp - K)))
    w2 = jnp.pad(w2, ((0, Kp - K), (0, Np - N)))
    scale2 = jnp.pad(scale.reshape(1, N), ((0, 0), (0, Np - N)))
    bias2 = jnp.pad(bias.reshape(1, N), ((0, 0), (0, Np - N)))

    # ---- grid order: re-stream the smaller operand ----
    in_isz = jnp.dtype(in_dt).itemsize
    out_isz = jnp.dtype(out_dt).itemsize
    lhs_bytes = Mp * Kp * in_isz
    w_bytes = Kp * Np * in_isz
    m_outer = w_bytes * n_m <= lhs_bytes * n_n
    if m_outer:
        grid = (n_m, n_n, n_k)
        lhs_map = lambda i, j, k: (i, k)
        w_map = lambda i, j, k: (k, j)
        sb_map = lambda i, j, k: (0, j)
        out_map = lambda i, j, k: (i, j)
        read_bytes = lhs_bytes * (1 if n_k == 1 else n_n) + w_bytes * n_m
    else:
        grid = (n_n, n_m, n_k)
        lhs_map = lambda j, i, k: (i, k)
        w_map = lambda j, i, k: (k, j)
        sb_map = lambda j, i, k: (0, j)
        out_map = lambda j, i, k: (i, j)
        read_bytes = lhs_bytes * n_n + w_bytes * (1 if n_k == 1 else n_m)

    kernel = _make_matmul_bn_relu_kernel(multi_k=n_k > 1)
    scratch_shapes = [pltpu.VMEM((TM, TN), jnp.float32)] if n_k > 1 else []

    # ---- VMEM budget: double-buffered blocks + scratch + headroom, clamped
    # to this chip generation's physical VMEM. ----
    block_bytes = (2 * (TM * TK + TK * TN) * in_isz      # lhs + weight tiles
                   + 2 * TM * TN * out_isz               # output tile
                   + 2 * 2 * TN * 4                      # scale + bias tiles
                   + (TM * TN * 4 if n_k > 1 else 0))    # accumulator scratch
    vmem_limit = max(int(block_bytes * 1.5) + (4 << 20), 32 << 20)
    vmem_limit = min(vmem_limit, int(_vmem_physical_bytes() * 0.85), 100 << 20)

    flops = 2 * Mp * Kp * Np + 3 * M * N
    bytes_accessed = read_bytes + Mp * Np * out_isz + 2 * Np * 4

    out_flat = pl.pallas_call(
        kernel,
        out_shape=jax.ShapeDtypeStruct((Mp, Np), out_dt),
        grid_spec=pltpu.PrefetchScalarGridSpec(
            num_scalar_prefetch=0,
            grid=grid,
            in_specs=[
                pl.BlockSpec((TM, TK), lhs_map),
                pl.BlockSpec((TK, TN), w_map),
                pl.BlockSpec((1, TN), sb_map),
                pl.BlockSpec((1, TN), sb_map),
            ],
            out_specs=pl.BlockSpec((TM, TN), out_map),
            scratch_shapes=scratch_shapes),
        compiler_params=pltpu.CompilerParams(
            dimension_semantics=("parallel", "parallel", "arbitrary"),
            vmem_limit_bytes=int(vmem_limit)),
        cost_estimate=pl.CostEstimate(
            flops=int(flops), transcendentals=0,
            bytes_accessed=int(bytes_accessed)),
    )(lhs, w2, scale2, bias2)

    # (Mp, Np) -> (B, OH, OW, C_out) -> (B, C_out, OH, OW)
    out = out_flat[:M, :N].reshape(B, OH, OW, C_out)
    return jnp.transpose(out, (0, 3, 1, 2))


def conv2d_bn_relu_ref(x, conv_w, conv_b, bn_gamma, bn_beta, bn_mean, bn_var,
                       *, stride=1, padding=0, dilation=1, eps=1e-5):
    """Pure-JAX reference mirroring the PyTorch forward (eval-mode BN)."""
    y = jax.lax.conv_general_dilated(
        x, conv_w,
        window_strides=(stride, stride),
        padding=[(padding, padding), (padding, padding)],
        rhs_dilation=(dilation, dilation),
        dimension_numbers=("NCHW", "OIHW", "NCHW"))
    y = y + conv_b.reshape(1, -1, 1, 1)
    g = bn_gamma.reshape(1, -1, 1, 1)
    bt = bn_beta.reshape(1, -1, 1, 1)
    m = bn_mean.reshape(1, -1, 1, 1)
    v = bn_var.reshape(1, -1, 1, 1)
    y = g * (y - m) / jnp.sqrt(v + eps) + bt
    return jnp.maximum(y, 0.0)


if __name__ == "__main__":
    B, C_in, C_out = 2, 4, 8
    H = W = 16
    K = 3
    stride, padding, dilation = 1, 1, 1

    key = jax.random.PRNGKey(0)
    kx, kw, kb, kg, kbt, km, kv = jax.random.split(key, 7)

    x = jax.random.normal(kx, (B, C_in, H, W), dtype=jnp.float32)
    conv_w = jax.random.normal(kw, (C_out, C_in, K, K), dtype=jnp.float32) * 0.1
    conv_b = jax.random.normal(kb, (C_out,), dtype=jnp.float32) * 0.1
    bn_gamma = 1.0 + 0.1 * jax.random.normal(kg, (C_out,), dtype=jnp.float32)
    bn_beta = 0.1 * jax.random.normal(kbt, (C_out,), dtype=jnp.float32)
    bn_mean = 0.1 * jax.random.normal(km, (C_out,), dtype=jnp.float32)
    bn_var = 0.5 + jnp.abs(jax.random.normal(kv, (C_out,), dtype=jnp.float32))

    out = conv2d_bn_relu(x, conv_w, conv_b, bn_gamma, bn_beta, bn_mean, bn_var,
                         stride=stride, padding=padding, dilation=dilation)
    out = jax.block_until_ready(out)

    ref = conv2d_bn_relu_ref(x, conv_w, conv_b, bn_gamma, bn_beta, bn_mean,
                             bn_var, stride=stride, padding=padding,
                             dilation=dilation)

    assert out.shape == (B, C_out, H, W), out.shape
    assert jnp.allclose(out, ref, atol=2e-3, rtol=2e-3), (
        "mismatch vs reference: max abs err = "
        f"{float(jnp.max(jnp.abs(out - ref)))}")

    print("KERNEL_OK")
</pallas_src>

<mosaic_0001>
module attributes {stable_mosaic.version = 11 : i64} {
  func.func @kernel(%arg0: i32, %arg1: i32, %arg2: i32, %arg3: memref<512x36xf32, #tpu.memory_space<vmem>>, %arg4: memref<36x128xf32, #tpu.memory_space<vmem>>, %arg5: memref<1x128xf32, #tpu.memory_space<vmem>>, %arg6: memref<1x128xf32, #tpu.memory_space<vmem>>, %arg7: memref<512x128xf32, #tpu.memory_space<vmem>>) attributes {dimension_semantics = [#tpu.dimension_semantics<parallel>, #tpu.dimension_semantics<parallel>, #tpu.dimension_semantics<arbitrary>], iteration_bounds = array<i64: 1, 1, 1>, scalar_prefetch = 0 : i64, scratch_operands = 0 : i64, tpu.core_type = #tpu.core_type<tc>, window_params = [{transform_indices = @transform_0, window_bounds = array<i64: 512, 36>}, {transform_indices = @transform_1, window_bounds = array<i64: 36, 128>}, {transform_indices = @transform_2, window_bounds = array<i64: 1, 128>}, {transform_indices = @transform_3, window_bounds = array<i64: 1, 128>}, {transform_indices = @transform_4, window_bounds = array<i64: 512, 128>}]} {
    %c0 = arith.constant 0 : index
    %c0_0 = arith.constant 0 : index
    %0 = vector.load %arg3[%c0, %c0_0] : memref<512x36xf32, #tpu.memory_space<vmem>>, vector<512x36xf32>
    %c0_1 = arith.constant 0 : index
    %c0_2 = arith.constant 0 : index
    %1 = vector.load %arg4[%c0_1, %c0_2] : memref<36x128xf32, #tpu.memory_space<vmem>>, vector<36x128xf32>
    %cst = arith.constant dense<0.000000e+00> : vector<512x128xf32>
    %2 = tpu.matmul %0, %1, %cst {dimension_numbers = #tpu.dot_dimension_numbers<[1], [0], [0], [1], [0, 0, 1, 1], [], []>} : vector<512x36xf32>, vector<36x128xf32>, vector<512x128xf32> -> vector<512x128xf32>
    %c0_3 = arith.constant 0 : index
    %c0_4 = arith.constant 0 : index
    %3 = vector.load %arg5[%c0_3, %c0_4] : memref<1x128xf32, #tpu.memory_space<vmem>>, vector<1x128xf32>
    %4 = vector.broadcast %3 : vector<1x128xf32> to vector<512x128xf32>
    %5 = arith.mulf %2, %4 : vector<512x128xf32>
    %c0_5 = arith.constant 0 : index
    %c0_6 = arith.constant 0 : index
    %6 = vector.load %arg6[%c0_5, %c0_6] : memref<1x128xf32, #tpu.memory_space<vmem>>, vector<1x128xf32>
    %7 = vector.broadcast %6 : vector<1x128xf32> to vector<512x128xf32>
    %8 = arith.addf %5, %7 : vector<512x128xf32>
    %cst_7 = arith.constant 0.000000e+00 : f32
    %9 = vector.broadcast %cst_7 : f32 to vector<512x128xf32>
    %10 = arith.maximumf %8, %9 : vector<512x128xf32>
    %c0_8 = arith.constant 0 : index
    %c0_9 = arith.constant 0 : index
    %11 = vector.load %arg7[%c0_8, %c0_9] : memref<512x128xf32, #tpu.memory_space<vmem>>, vector<512x128xf32>
    tpu.vector_store %arg7[%c0_8, %c0_9], %10 {strides = array<i32>} : memref<512x128xf32, #tpu.memory_space<vmem>>, vector<512x128xf32>,
    return
  }
  func.func @transform_0(%arg0: i32, %arg1: i32, %arg2: i32) -> (i32, i32) {
    %c0_i32 = arith.constant 0 : i32
    return %arg0, %arg2 : i32, i32
  }
  func.func @transform_1(%arg0: i32, %arg1: i32, %arg2: i32) -> (i32, i32) {
    %c0_i32 = arith.constant 0 : i32
    return %arg2, %arg1 : i32, i32
  }
  func.func @transform_2(%arg0: i32, %arg1: i32, %arg2: i32) -> (i32, i32) {
    %c0_i32 = arith.constant 0 : i32
    %c0_i32_0 = arith.constant 0 : i32
    return %c0_i32, %arg1 : i32, i32
  }
  func.func @transform_3(%arg0: i32, %arg1: i32, %arg2: i32) -> (i32, i32) {
    %c0_i32 = arith.constant 0 : i32
    %c0_i32_0 = arith.constant 0 : i32
    return %c0_i32, %arg1 : i32, i32
  }
  func.func @transform_4(%arg0: i32, %arg1: i32, %arg2: i32) -> (i32, i32) {
    %c0_i32 = arith.constant 0 : i32
    return %arg0, %arg1 : i32, i32
  }
}

</mosaic_0001>

<bundles_post_ra>
// kernel: conv2d_bn_relu.1
= control target key start
LH: loop header
LB: loop body
LE: loop exit
PB: predicated region body
PF: predicated region fallthrough
CT: control target
= control target key end

     0   :  { %vm86_vm0 = vcmask 293888   ;;  %vm279_vm1 = vcmask 1043456   ;;  %s1824_s1 = inlined_call_operand.vmem [shape: f32[36,128], index: 1, kind: input, shape index: {}]   ;;  %s1825_s0 = inlined_call_operand.vmem [shape: f32[512,36], index: 0, kind: input, shape index: {}]   ;;  %s1826_s2 = inlined_call_operand.vmem [shape: f32[1,128], index: 2, kind: input, shape index: {}]   ;;  %s1827_s3 = inlined_call_operand.vmem [shape: f32[1,128], index: 3, kind: input, shape index: {}]   ;;  %s1828_s4 = inlined_call_operand.vmem [shape: f32[512,128], index: 4, kind: output, shape index: {}]  }
   0x1   :  { %v81_v0 = vld [vmem:[%s1824_s1] sm:$0xff]  ;;  %v82_v1 = vld [vmem:[%s1824_s1 + $0x8] sm:$0xff]  ;;  %v83_v2 = vld [vmem:[%s1824_s1 + $0x10] sm:$0xff] }
   0x2   :  { %v1184_v3 = vpack.c.bf16 %v82_v1, %v81_v0  ;;  %v84_v4 = vld [vmem:[%s1824_s1 + $0x18] sm:$0xff]  ;;  %v17_v5 = vld [vmem:[%s1825_s0] sm:$0xff]  ;;  %v18_v9 = vld [vmem:[%s1825_s0 + $0x8] sm:$0xff] }
   0x3   :  { %v1188_v6 = vpack.c.bf16 %v84_v4, %v83_v2  ;;  %1088 = vmatprep.mubr.msk.f32.mxu0 %vm86_vm0, %v17_v5  ;;  %v49_v7 = vld [vmem:[%s1825_s0 + $0x100] sm:$0xff]  ;;  %v50_v10 = vld [vmem:[%s1825_s0 + $0x108] sm:$0xff]  ;;  %v19_v11 = vld [vmem:[%s1825_s0 + $0x10] sm:$0xff] }
   0x4   :  { %1185 = vmatprep.subr.bf16.mxu0 %v1184_v3  ;;  %1192 = vmatprep.subr.bf16.mxu1 %v1184_v3  ;;  %v85_v8 = vld [vmem:[%s1824_s1 + $0x20] sm:$0xf]  ;;  %v51_v12 = vld [vmem:[%s1825_s0 + $0x110] sm:$0xff]  ;;  %v20_v13 = vld [vmem:[%s1825_s0 + $0x18] sm:$0xff] }
   0x5   :  { %1187 = vmatpush3.bf16.msra.mxu0 %v1184_v3  ;;  %1195 = vmatpush3.bf16.msra.mxu1 %v1184_v3  ;;  %v52_v14 = vld [vmem:[%s1825_s0 + $0x118] sm:$0xff]  ;;  %v21_v15 = vld [vmem:[%s1825_s0 + $0x20] sm:$0xff]  ;;  %v22_v17 = vld [vmem:[%s1825_s0 + $0x28] sm:$0xff] }
   0x6   :  { %1189 = vmatprep.subr.bf16.mxu0 %v1188_v6  ;;  %1193 = vmatprep.subr.bf16.mxu1 %v1188_v6  ;;  %v53_v16 = vld [vmem:[%s1825_s0 + $0x120] sm:$0xff]  ;;  %v54_v18 = vld [vmem:[%s1825_s0 + $0x128] sm:$0xff]  ;;  %v23_v19 = vld [vmem:[%s1825_s0 + $0x30] sm:$0xff] }
   0x7   :  { %1136 = vmatprep.mubr.msk.f32.mxu1 %vm86_vm0, %v49_v7  ;;  %v55_v20 = vld [vmem:[%s1825_s0 + $0x130] sm:$0xff]  ;;  %v24_v21 = vld [vmem:[%s1825_s0 + $0x38] sm:$0xff]  ;;  %v25_v23 = vld [vmem:[%s1825_s0 + $0x40] sm:$0xff] }
   0x8   :  { %v56_v22 = vld [vmem:[%s1825_s0 + $0x138] sm:$0xff]  ;;  %v57_v24 = vld [vmem:[%s1825_s0 + $0x140] sm:$0xff]  ;;  %v26_v25 = vld [vmem:[%s1825_s0 + $0x48] sm:$0xff] }
   0x9   :  { %1191 = vmatpush3.bf16.msra.mxu0 %v1188_v6  ;;  %1196 = vmatpush3.bf16.msra.mxu1 %v1188_v6  ;;  %v58_v26 = vld [vmem:[%s1825_s0 + $0x148] sm:$0xff]  ;;  %v27_v27 = vld [vmem:[%s1825_s0 + $0x50] sm:$0xff]  ;;  %v28_v29 = vld [vmem:[%s1825_s0 + $0x58] sm:$0xff] }
   0xa   :  { %1086 = vmatprep.subr.msk.mxu0 %vm279_vm1, %v85_v8  ;;  %1194 = vmatprep.subr.msk.mxu1 %vm279_vm1, %v85_v8  ;;  %v59_v28 = vld [vmem:[%s1825_s0 + $0x150] sm:$0xff]  ;;  %v60_v30 = vld [vmem:[%s1825_s0 + $0x158] sm:$0xff]  ;;  %v29_v31 = vld [vmem:[%s1825_s0 + $0x60] sm:$0xff] }
   0xb   :  { %v61_v32 = vld [vmem:[%s1825_s0 + $0x160] sm:$0xff]  ;;  %v30_v33 = vld [vmem:[%s1825_s0 + $0x68] sm:$0xff]  ;;  %v31_v35 = vld [vmem:[%s1825_s0 + $0x70] sm:$0xff] }
   0xc   :  { %v62_v34 = vld [vmem:[%s1825_s0 + $0x168] sm:$0xff]  ;;  %v63_v36 = vld [vmem:[%s1825_s0 + $0x170] sm:$0xff]  ;;  %v32_v37 = vld [vmem:[%s1825_s0 + $0x78] sm:$0xff] }
   0xd   :  { %1087 = vmatpush3.msk.msra.mxu0 %vm279_vm1, %v85_v8  ;;  %1197 = vmatpush3.msk.msra.mxu1 %vm279_vm1, %v85_v8  ;;  %v64_v38 = vld [vmem:[%s1825_s0 + $0x178] sm:$0xff]  ;;  %v33_v39 = vld [vmem:[%s1825_s0 + $0x80] sm:$0xff]  ;;  %v34_v41 = vld [vmem:[%s1825_s0 + $0x88] sm:$0xff] }
   0xe   :  { %1089 = vmatmul.mubr.msk.f32.vlgmr.msra.gmra.mrb[0].mxu0 %vm86_vm0, %v18_v9  ;;  %1137 = vmatmul.mubr.msk.f32.vlgmr.msra.gmra.mrb[0].mxu1 %vm86_vm0, %v50_v10  ;;  %v65_v40 = vld [vmem:[%s1825_s0 + $0x180] sm:$0xff]  ;;  %v66_v42 = vld [vmem:[%s1825_s0 + $0x188] sm:$0xff]  ;;  %v35_v43 = vld [vmem:[%s1825_s0 + $0x90] sm:$0xff] }
   0xf   :  { %1091 = vmatprep.mubr.msk.f32.mxu0 %vm86_vm0, %v19_v11  ;;  %1139 = vmatprep.mubr.msk.f32.mxu1 %vm86_vm0, %v51_v12  ;;  %v67_v44 = vld [vmem:[%s1825_s0 + $0x190] sm:$0xff]  ;;  %v36_v45 = vld [vmem:[%s1825_s0 + $0x98] sm:$0xff]  ;;  %v37_v47 = vld [vmem:[%s1825_s0 + $0xa0] sm:$0xff] }
  0x10   :  { %v68_v46 = vld [vmem:[%s1825_s0 + $0x198] sm:$0xff]  ;;  %v69_v48 = vld [vmem:[%s1825_s0 + $0x1a0] sm:$0xff]  ;;  %v38_v49 = vld [vmem:[%s1825_s0 + $0xa8] sm:$0xff] }
  0x11   :  { %v70_v50 = vld [vmem:[%s1825_s0 + $0x1a8] sm:$0xff]  ;;  %v39_v51 = vld [vmem:[%s1825_s0 + $0xb0] sm:$0xff]  ;;  %v40_v53 = vld [vmem:[%s1825_s0 + $0xb8] sm:$0xff] }
  0x12   :  { %1092 = vmatmul.mubr.msk.f32.gmra.mrb[2].mxu0 %vm86_vm0, %v20_v13  ;;  %1140 = vmatmul.mubr.msk.f32.gmra.mrb[2].mxu1 %vm86_vm0, %v52_v14  ;;  %v71_v52 = vld [vmem:[%s1825_s0 + $0x1b0] sm:$0xff]  ;;  %v72_v54 = vld [vmem:[%s1825_s0 + $0x1b8] sm:$0xff]  ;;  %v41_v55 = vld [vmem:[%s1825_s0 + $0xc0] sm:$0xff] }
  0x13   :  { %1094 = vmatprep.mubr.msk.f32.mxu0 %vm86_vm0, %v21_v15  ;;  %1142 = vmatprep.mubr.msk.f32.mxu1 %vm86_vm0, %v53_v16  ;;  %v73_v56 = vld [vmem:[%s1825_s0 + $0x1c0] sm:$0xff]  ;;  %v42_v57 = vld [vmem:[%s1825_s0 + $0xc8] sm:$0xff]  ;;  %v43_v59 = vld [vmem:[%s1825_s0 + $0xd0] sm:$0xff] }
  0x14   :  { %v74_v58 = vld [vmem:[%s1825_s0 + $0x1c8] sm:$0xff]  ;;  %v75_v60 = vld [vmem:[%s1825_s0 + $0x1d0] sm:$0xff]  ;;  %v44_v61 = vld [vmem:[%s1825_s0 + $0xd8] sm:$0xff] }
  0x15   :  { %v76_v62 = vld [vmem:[%s1825_s0 + $0x1d8] sm:$0xff]  ;;  %v45_v63 = vld [vmem:[%s1825_s0 + $0xe0] sm:$0xff]  ;;  %v46_v1 = vld [vmem:[%s1825_s0 + $0xe8] sm:$0xff] }
  0x16   :  { %1095 = vmatmul.mubr.msk.f32.gmra.mrb[4].mxu0 %vm86_vm0, %v22_v17  ;;  %1143 = vmatmul.mubr.msk.f32.gmra.mrb[4].mxu1 %vm86_vm0, %v54_v18  ;;  %v77_v0 = vld [vmem:[%s1825_s0 + $0x1e0] sm:$0xff]  ;;  %v78_v2 = vld [vmem:[%s1825_s0 + $0x1e8] sm:$0xff]  ;;  %v47_v3 = vld [vmem:[%s1825_s0 + $0xf0] sm:$0xff] }
  0x17   :  { %1097 = vmatprep.mubr.msk.f32.mxu0 %vm86_vm0, %v23_v19  ;;  %1145 = vmatprep.mubr.msk.f32.mxu1 %vm86_vm0, %v55_v20  ;;  %v79_v4 = vld [vmem:[%s1825_s0 + $0x1f0] sm:$0xff]  ;;  %v48_v5 = vld [vmem:[%s1825_s0 + $0xf8] sm:$0xff]  ;;  %v1497_v7 = vld [vmem:[%s1826_s2] ss:$0 sm:$0xff] }
  0x18   :  { %v80_v6 = vld [vmem:[%s1825_s0 + $0x1f8] sm:$0xff]  ;;  %v1502_v9 = vld [vmem:[%s1827_s3] ss:$0 sm:$0xff] }
  0x1a   :  { %1098 = vmatmul.mubr.msk.f32.gmra.mrb[6].mxu0 %vm86_vm0, %v24_v21  ;;  %1146 = vmatmul.mubr.msk.f32.gmra.mrb[6].mxu1 %vm86_vm0, %v56_v22 }
  0x1b   :  { %1100 = vmatprep.mubr.msk.f32.mxu0 %vm86_vm0, %v25_v23  ;;  %1148 = vmatprep.mubr.msk.f32.mxu1 %vm86_vm0, %v57_v24 }
  0x1e   :  { %1101 = vmatmul.mubr.msk.f32.gmra.mrb[8].mxu0 %vm86_vm0, %v26_v25  ;;  %1149 = vmatmul.mubr.msk.f32.gmra.mrb[8].mxu1 %vm86_vm0, %v58_v26 }
  0x1f   :  { %1103 = vmatprep.mubr.msk.f32.mxu0 %vm86_vm0, %v27_v27  ;;  %1151 = vmatprep.mubr.msk.f32.mxu1 %vm86_vm0, %v59_v28 }
  0x22   :  { %1104 = vmatmul.mubr.msk.f32.gmra.mrb[10].mxu0 %vm86_vm0, %v28_v29  ;;  %1152 = vmatmul.mubr.msk.f32.gmra.mrb[10].mxu1 %vm86_vm0, %v60_v30 }
  0x23   :  { %1106 = vmatprep.mubr.msk.f32.mxu0 %vm86_vm0, %v29_v31  ;;  %1154 = vmatprep.mubr.msk.f32.mxu1 %vm86_vm0, %v61_v32 }
  0x26   :  { %1107 = vmatmul.mubr.msk.f32.gmra.mrb[12].mxu0 %vm86_vm0, %v30_v33  ;;  %1155 = vmatmul.mubr.msk.f32.gmra.mrb[12].mxu1 %vm86_vm0, %v62_v34 }
  0x27   :  { %1109 = vmatprep.mubr.msk.f32.mxu0 %vm86_vm0, %v31_v35  ;;  %1157 = vmatprep.mubr.msk.f32.mxu1 %vm86_vm0, %v63_v36 }
  0x2a   :  { %1110 = vmatmul.mubr.msk.f32.gmra.mrb[14].mxu0 %vm86_vm0, %v32_v37  ;;  %1158 = vmatmul.mubr.msk.f32.gmra.mrb[14].mxu1 %vm86_vm0, %v64_v38 }
  0x2b   :  { %1112 = vmatprep.mubr.msk.f32.mxu0 %vm86_vm0, %v33_v39  ;;  %1160 = vmatprep.mubr.msk.f32.mxu1 %vm86_vm0, %v65_v40 }
  0x2e   :  { %1113 = vmatmul.mubr.msk.f32.gmra.mrb[16].mxu0 %vm86_vm0, %v34_v41  ;;  %1161 = vmatmul.mubr.msk.f32.gmra.mrb[16].mxu1 %vm86_vm0, %v66_v42 }
  0x2f   :  { %1115 = vmatprep.mubr.msk.f32.mxu0 %vm86_vm0, %v35_v43  ;;  %1163 = vmatprep.mubr.msk.f32.mxu1 %vm86_vm0, %v67_v44 }
  0x32   :  { %1116 = vmatmul.mubr.msk.f32.gmra.mrb[18].mxu0 %vm86_vm0, %v36_v45  ;;  %1164 = vmatmul.mubr.msk.f32.gmra.mrb[18].mxu1 %vm86_vm0, %v68_v46 }
  0x33   :  { %1118 = vmatprep.mubr.msk.f32.mxu0 %vm86_vm0, %v37_v47  ;;  %1166 = vmatprep.mubr.msk.f32.mxu1 %vm86_vm0, %v69_v48 }
  0x36   :  { %1119 = vmatmul.mubr.msk.f32.gmra.mrb[20].mxu0 %vm86_vm0, %v38_v49  ;;  %1167 = vmatmul.mubr.msk.f32.gmra.mrb[20].mxu1 %vm86_vm0, %v70_v50 }
  0x37   :  { %1121 = vmatprep.mubr.msk.f32.mxu0 %vm86_vm0, %v39_v51  ;;  %1169 = vmatprep.mubr.msk.f32.mxu1 %vm86_vm0, %v71_v52 }
  0x3a   :  { %1122 = vmatmul.mubr.msk.f32.gmra.mrb[22].mxu0 %vm86_vm0, %v40_v53  ;;  %1170 = vmatmul.mubr.msk.f32.gmra.mrb[22].mxu1 %vm86_vm0, %v72_v54 }
  0x3b   :  { %1124 = vmatprep.mubr.msk.f32.mxu0 %vm86_vm0, %v41_v55  ;;  %1172 = vmatprep.mubr.msk.f32.mxu1 %vm86_vm0, %v73_v56 }
  0x3e   :  { %1125 = vmatmul.mubr.msk.f32.gmra.mrb[24].mxu0 %vm86_vm0, %v42_v57  ;;  %1173 = vmatmul.mubr.msk.f32.gmra.mrb[24].mxu1 %vm86_vm0, %v74_v58 }
  0x3f   :  { %1127 = vmatprep.mubr.msk.f32.mxu0 %vm86_vm0, %v43_v59  ;;  %1175 = vmatprep.mubr.msk.f32.mxu1 %vm86_vm0, %v75_v60 }
  0x42   :  { %1128 = vmatmul.mubr.msk.f32.gmra.mrb[26].mxu0 %vm86_vm0, %v44_v61  ;;  %1176 = vmatmul.mubr.msk.f32.gmra.mrb[26].mxu1 %vm86_vm0, %v76_v62 }
  0x43   :  { %1130 = vmatprep.mubr.msk.f32.mxu0 %vm86_vm0, %v45_v63  ;;  %1178 = vmatprep.mubr.msk.f32.mxu1 %vm86_vm0, %v77_v0 }
  0x46   :  { %1131 = vmatmul.mubr.msk.f32.gmra.mrb[28].mxu0 %vm86_vm0, %v46_v1  ;;  %1179 = vmatmul.mubr.msk.f32.gmra.mrb[28].mxu1 %vm86_vm0, %v78_v2 }
  0x47   :  { %1133 = vmatprep.mubr.msk.f32.mxu0 %vm86_vm0, %v47_v3  ;;  %1181 = vmatprep.mubr.msk.f32.mxu1 %vm86_vm0, %v79_v4 }
  0x4a   :  { %1134 = vmatmul.mubr.msk.f32.gmra.mrb[30].mxu0 %vm86_vm0, %v48_v5  ;;  %1182 = vmatmul.mubr.msk.f32.gmra.mrb[30].mxu1 %vm86_vm0, %v80_v6 }
  0xe1   :  { %v1090_v8 = vpop.f32.mrb[0].mxu0  ;;  %v1138_v10 = vpop.f32.mrb[0].mxu1 }
  0xe2   :  { %v676_v11 = vmul.f32 %v1090_v8, %v1497_v7  ;;  %v708_v12 = vmul.f32 %v1138_v10, %v1497_v7  ;;  %v349_v13 = vpop.f32.mrb[1].mxu0  ;;  %v509_v14 = vpop.f32.mrb[1].mxu1 }
  0xe3   :  { %v675_v15 = vmul.f32 %v1497_v7, %v349_v13  ;;  %v707_v16 = vmul.f32 %v1497_v7, %v509_v14 }
  0xe4   :  { %v747_v17 = vadd.f32 %v1502_v9, %v676_v11  ;;  %v779_v18 = vadd.f32 %v1502_v9, %v708_v12 }
  0xe5   :  { %v746_v19 = vadd.f32 %v1502_v9, %v675_v15  ;;  %v778_v20 = vadd.f32 %v1502_v9, %v707_v16  ;;  %v1093_v21 = vpop.f32.mrb[2].mxu0  ;;  %v1141_v22 = vpop.f32.mrb[2].mxu1 }
  0xe6   :  { %v811_v23 = vmax.f32 %v747_v17, 0.0  ;;  %v843_v24 = vmax.f32 %v779_v18, 0.0  ;;  %v678_v25 = vmul.f32 %v1093_v21, %v1497_v7  ;;  %v710_v26 = vmul.f32 %v1141_v22, %v1497_v7  ;;  %v359_v27 = vpop.f32.mrb[3].mxu0  ;;  %v519_v28 = vpop.f32.mrb[3].mxu1 }
  0xe7   :  { %v810_v29 = vmax.f32 %v746_v19, 0.0  ;;  %v842_v30 = vmax.f32 %v778_v20, 0.0  ;;  %v677_v31 = vmul.f32 %v1497_v7, %v359_v27  ;;  %v709_v32 = vmul.f32 %v1497_v7, %v519_v28 }
  0xe8   :  { %875 = vst [vmem:[%s1828_s4 + $0x8] sm:$0xff] %v811_v23  ;;  %907 = vst [vmem:[%s1828_s4 + $0x108] sm:$0xff] %v843_v24  ;;  %v749_v33 = vadd.f32 %v1502_v9, %v678_v25  ;;  %v781_v34 = vadd.f32 %v1502_v9, %v710_v26 }
  0xe9   :  { %874 = vst [vmem:[%s1828_s4] sm:$0xff] %v810_v29  ;;  %906 = vst [vmem:[%s1828_s4 + $0x100] sm:$0xff] %v842_v30  ;;  %v748_v35 = vadd.f32 %v1502_v9, %v677_v31  ;;  %v780_v36 = vadd.f32 %v1502_v9, %v709_v32  ;;  %v1096_v37 = vpop.f32.mrb[4].mxu0  ;;  %v1144_v38 = vpop.f32.mrb[4].mxu1 }
  0xea   :  { %v813_v39 = vmax.f32 %v749_v33, 0.0  ;;  %v845_v40 = vmax.f32 %v781_v34, 0.0  ;;  %v680_v41 = vmul.f32 %v1096_v37, %v1497_v7  ;;  %v712_v42 = vmul.f32 %v1144_v38, %v1497_v7  ;;  %v369_v43 = vpop.f32.mrb[5].mxu0  ;;  %v529_v44 = vpop.f32.mrb[5].mxu1 }
  0xeb   :  { %v812_v45 = vmax.f32 %v748_v35, 0.0  ;;  %v844_v46 = vmax.f32 %v780_v36, 0.0  ;;  %v679_v47 = vmul.f32 %v1497_v7, %v369_v43  ;;  %v711_v48 = vmul.f32 %v1497_v7, %v529_v44 }
  0xec   :  { %877 = vst [vmem:[%s1828_s4 + $0x18] sm:$0xff] %v813_v39  ;;  %909 = vst [vmem:[%s1828_s4 + $0x118] sm:$0xff] %v845_v40  ;;  %v751_v49 = vadd.f32 %v1502_v9, %v680_v41  ;;  %v783_v50 = vadd.f32 %v1502_v9, %v712_v42 }
  0xed   :  { %876 = vst [vmem:[%s1828_s4 + $0x10] sm:$0xff] %v812_v45  ;;  %908 = vst [vmem:[%s1828_s4 + $0x110] sm:$0xff] %v844_v46  ;;  %v750_v51 = vadd.f32 %v1502_v9, %v679_v47  ;;  %v782_v52 = vadd.f32 %v1502_v9, %v711_v48  ;;  %v1099_v53 = vpop.f32.mrb[6].mxu0  ;;  %v1147_v54 = vpop.f32.mrb[6].mxu1 }
  0xee   :  { %v815_v55 = vmax.f32 %v751_v49, 0.0  ;;  %v847_v56 = vmax.f32 %v783_v50, 0.0  ;;  %v682_v57 = vmul.f32 %v1099_v53, %v1497_v7  ;;  %v714_v58 = vmul.f32 %v1147_v54, %v1497_v7  ;;  %v379_v59 = vpop.f32.mrb[7].mxu0  ;;  %v539_v60 = vpop.f32.mrb[7].mxu1 }
  0xef   :  { %v814_v61 = vmax.f32 %v750_v51, 0.0  ;;  %v846_v62 = vmax.f32 %v782_v52, 0.0  ;;  %v681_v63 = vmul.f32 %v1497_v7, %v379_v59  ;;  %v713_v0 = vmul.f32 %v1497_v7, %v539_v60 }
  0xf0   :  { %879 = vst [vmem:[%s1828_s4 + $0x28] sm:$0xff] %v815_v55  ;;  %911 = vst [vmem:[%s1828_s4 + $0x128] sm:$0xff] %v847_v56  ;;  %v753_v1 = vadd.f32 %v1502_v9, %v682_v57  ;;  %v785_v2 = vadd.f32 %v1502_v9, %v714_v58 }
  0xf1   :  { %878 = vst [vmem:[%s1828_s4 + $0x20] sm:$0xff] %v814_v61  ;;  %910 = vst [vmem:[%s1828_s4 + $0x120] sm:$0xff] %v846_v62  ;;  %v752_v3 = vadd.f32 %v1502_v9, %v681_v63  ;;  %v784_v4 = vadd.f32 %v1502_v9, %v713_v0  ;;  %v1102_v5 = vpop.f32.mrb[8].mxu0  ;;  %v1150_v6 = vpop.f32.mrb[8].mxu1 }
  0xf2   :  { %v817_v8 = vmax.f32 %v753_v1, 0.0  ;;  %v849_v10 = vmax.f32 %v785_v2, 0.0  ;;  %v684_v11 = vmul.f32 %v1102_v5, %v1497_v7  ;;  %v716_v12 = vmul.f32 %v1150_v6, %v1497_v7  ;;  %v389_v13 = vpop.f32.mrb[9].mxu0  ;;  %v549_v14 = vpop.f32.mrb[9].mxu1 }
  0xf3   :  { %v816_v15 = vmax.f32 %v752_v3, 0.0  ;;  %v848_v16 = vmax.f32 %v784_v4, 0.0  ;;  %v683_v17 = vmul.f32 %v1497_v7, %v389_v13  ;;  %v715_v18 = vmul.f32 %v1497_v7, %v549_v14 }
  0xf4   :  { %881 = vst [vmem:[%s1828_s4 + $0x38] sm:$0xff] %v817_v8  ;;  %913 = vst [vmem:[%s1828_s4 + $0x138] sm:$0xff] %v849_v10  ;;  %v755_v19 = vadd.f32 %v1502_v9, %v684_v11  ;;  %v787_v20 = vadd.f32 %v1502_v9, %v716_v12 }
  0xf5   :  { %880 = vst [vmem:[%s1828_s4 + $0x30] sm:$0xff] %v816_v15  ;;  %912 = vst [vmem:[%s1828_s4 + $0x130] sm:$0xff] %v848_v16  ;;  %v754_v21 = vadd.f32 %v1502_v9, %v683_v17  ;;  %v786_v22 = vadd.f32 %v1502_v9, %v715_v18  ;;  %v1105_v23 = vpop.f32.mrb[10].mxu0  ;;  %v1153_v24 = vpop.f32.mrb[10].mxu1 }
  0xf6   :  { %v819_v25 = vmax.f32 %v755_v19, 0.0  ;;  %v851_v26 = vmax.f32 %v787_v20, 0.0  ;;  %v686_v27 = vmul.f32 %v1105_v23, %v1497_v7  ;;  %v718_v28 = vmul.f32 %v1153_v24, %v1497_v7  ;;  %v399_v29 = vpop.f32.mrb[11].mxu0  ;;  %v559_v30 = vpop.f32.mrb[11].mxu1 }
  0xf7   :  { %v818_v31 = vmax.f32 %v754_v21, 0.0  ;;  %v850_v32 = vmax.f32 %v786_v22, 0.0  ;;  %v685_v33 = vmul.f32 %v1497_v7, %v399_v29  ;;  %v717_v34 = vmul.f32 %v1497_v7, %v559_v30 }
  0xf8   :  { %883 = vst [vmem:[%s1828_s4 + $0x48] sm:$0xff] %v819_v25  ;;  %915 = vst [vmem:[%s1828_s4 + $0x148] sm:$0xff] %v851_v26  ;;  %v757_v35 = vadd.f32 %v1502_v9, %v686_v27  ;;  %v789_v36 = vadd.f32 %v1502_v9, %v718_v28 }
  0xf9   :  { %882 = vst [vmem:[%s1828_s4 + $0x40] sm:$0xff] %v818_v31  ;;  %914 = vst [vmem:[%s1828_s4 + $0x140] sm:$0xff] %v850_v32  ;;  %v756_v37 = vadd.f32 %v1502_v9, %v685_v33  ;;  %v788_v38 = vadd.f32 %v1502_v9, %v717_v34  ;;  %v1108_v39 = vpop.f32.mrb[12].mxu0  ;;  %v1156_v40 = vpop.f32.mrb[12].mxu1 }
  0xfa   :  { %v821_v41 = vmax.f32 %v757_v35, 0.0  ;;  %v853_v42 = vmax.f32 %v789_v36, 0.0  ;;  %v688_v43 = vmul.f32 %v1108_v39, %v1497_v7  ;;  %v720_v44 = vmul.f32 %v1156_v40, %v1497_v7  ;;  %v409_v45 = vpop.f32.mrb[13].mxu0  ;;  %v569_v46 = vpop.f32.mrb[13].mxu1 }
  0xfb   :  { %v820_v47 = vmax.f32 %v756_v37, 0.0  ;;  %v852_v48 = vmax.f32 %v788_v38, 0.0  ;;  %v687_v49 = vmul.f32 %v1497_v7, %v409_v45  ;;  %v719_v50 = vmul.f32 %v1497_v7, %v569_v46 }
  0xfc   :  { %885 = vst [vmem:[%s1828_s4 + $0x58] sm:$0xff] %v821_v41  ;;  %917 = vst [vmem:[%s1828_s4 + $0x158] sm:$0xff] %v853_v42  ;;  %v759_v51 = vadd.f32 %v1502_v9, %v688_v43  ;;  %v791_v52 = vadd.f32 %v1502_v9, %v720_v44 }
  0xfd   :  { %884 = vst [vmem:[%s1828_s4 + $0x50] sm:$0xff] %v820_v47  ;;  %916 = vst [vmem:[%s1828_s4 + $0x150] sm:$0xff] %v852_v48  ;;  %v758_v53 = vadd.f32 %v1502_v9, %v687_v49  ;;  %v790_v54 = vadd.f32 %v1502_v9, %v719_v50  ;;  %v1111_v55 = vpop.f32.mrb[14].mxu0  ;;  %v1159_v56 = vpop.f32.mrb[14].mxu1 }
  0xfe   :  { %v823_v57 = vmax.f32 %v759_v51, 0.0  ;;  %v855_v58 = vmax.f32 %v791_v52, 0.0  ;;  %v690_v59 = vmul.f32 %v1111_v55, %v1497_v7  ;;  %v722_v60 = vmul.f32 %v1159_v56, %v1497_v7  ;;  %v419_v61 = vpop.f32.mrb[15].mxu0  ;;  %v579_v62 = vpop.f32.mrb[15].mxu1 }
  0xff   :  { %v822_v63 = vmax.f32 %v758_v53, 0.0  ;;  %v854_v0 = vmax.f32 %v790_v54, 0.0  ;;  %v689_v1 = vmul.f32 %v1497_v7, %v419_v61  ;;  %v721_v2 = vmul.f32 %v1497_v7, %v579_v62 }
 0x100   :  { %887 = vst [vmem:[%s1828_s4 + $0x68] sm:$0xff] %v823_v57  ;;  %919 = vst [vmem:[%s1828_s4 + $0x168] sm:$0xff] %v855_v58  ;;  %v761_v3 = vadd.f32 %v1502_v9, %v690_v59  ;;  %v793_v4 = vadd.f32 %v1502_v9, %v722_v60 }
 0x101   :  { %886 = vst [vmem:[%s1828_s4 + $0x60] sm:$0xff] %v822_v63  ;;  %918 = vst [vmem:[%s1828_s4 + $0x160] sm:$0xff] %v854_v0  ;;  %v760_v5 = vadd.f32 %v1502_v9, %v689_v1  ;;  %v792_v6 = vadd.f32 %v1502_v9, %v721_v2  ;;  %v1114_v8 = vpop.f32.mrb[16].mxu0  ;;  %v1162_v10 = vpop.f32.mrb[16].mxu1 }
 0x102   :  { %v825_v11 = vmax.f32 %v761_v3, 0.0  ;;  %v857_v12 = vmax.f32 %v793_v4, 0.0  ;;  %v692_v13 = vmul.f32 %v1114_v8, %v1497_v7  ;;  %v724_v14 = vmul.f32 %v1162_v10, %v1497_v7  ;;  %v429_v15 = vpop.f32.mrb[17].mxu0  ;;  %v589_v16 = vpop.f32.mrb[17].mxu1 }
 0x103   :  { %v824_v17 = vmax.f32 %v760_v5, 0.0  ;;  %v856_v18 = vmax.f32 %v792_v6, 0.0  ;;  %v691_v19 = vmul.f32 %v1497_v7, %v429_v15  ;;  %v723_v20 = vmul.f32 %v1497_v7, %v589_v16 }
 0x104   :  { %889 = vst [vmem:[%s1828_s4 + $0x78] sm:$0xff] %v825_v11  ;;  %921 = vst [vmem:[%s1828_s4 + $0x178] sm:$0xff] %v857_v12  ;;  %v763_v21 = vadd.f32 %v1502_v9, %v692_v13  ;;  %v795_v22 = vadd.f32 %v1502_v9, %v724_v14 }
 0x105   :  { %888 = vst [vmem:[%s1828_s4 + $0x70] sm:$0xff] %v824_v17  ;;  %920 = vst [vmem:[%s1828_s4 + $0x170] sm:$0xff] %v856_v18  ;;  %v762_v23 = vadd.f32 %v1502_v9, %v691_v19  ;;  %v794_v24 = vadd.f32 %v1502_v9, %v723_v20  ;;  %v1117_v25 = vpop.f32.mrb[18].mxu0  ;;  %v1165_v26 = vpop.f32.mrb[18].mxu1 }
 0x106   :  { %v827_v27 = vmax.f32 %v763_v21, 0.0  ;;  %v859_v28 = vmax.f32 %v795_v22, 0.0  ;;  %v694_v29 = vmul.f32 %v1117_v25, %v1497_v7  ;;  %v726_v30 = vmul.f32 %v1165_v26, %v1497_v7  ;;  %v439_v31 = vpop.f32.mrb[19].mxu0  ;;  %v599_v32 = vpop.f32.mrb[19].mxu1 }
 0x107   :  { %v826_v33 = vmax.f32 %v762_v23, 0.0  ;;  %v858_v34 = vmax.f32 %v794_v24, 0.0  ;;  %v693_v35 = vmul.f32 %v1497_v7, %v439_v31  ;;  %v725_v36 = vmul.f32 %v1497_v7, %v599_v32 }
 0x108   :  { %891 = vst [vmem:[%s1828_s4 + $0x88] sm:$0xff] %v827_v27  ;;  %923 = vst [vmem:[%s1828_s4 + $0x188] sm:$0xff] %v859_v28  ;;  %v765_v37 = vadd.f32 %v1502_v9, %v694_v29  ;;  %v797_v38 = vadd.f32 %v1502_v9, %v726_v30 }
 0x109   :  { %890 = vst [vmem:[%s1828_s4 + $0x80] sm:$0xff] %v826_v33  ;;  %922 = vst [vmem:[%s1828_s4 + $0x180] sm:$0xff] %v858_v34  ;;  %v764_v39 = vadd.f32 %v1502_v9, %v693_v35  ;;  %v796_v40 = vadd.f32 %v1502_v9, %v725_v36  ;;  %v1120_v41 = vpop.f32.mrb[20].mxu0  ;;  %v1168_v42 = vpop.f32.mrb[20].mxu1 }
 0x10a   :  { %v829_v43 = vmax.f32 %v765_v37, 0.0  ;;  %v861_v44 = vmax.f32 %v797_v38, 0.0  ;;  %v696_v45 = vmul.f32 %v1120_v41, %v1497_v7  ;;  %v728_v46 = vmul.f32 %v1168_v42, %v1497_v7  ;;  %v449_v47 = vpop.f32.mrb[21].mxu0  ;;  %v609_v48 = vpop.f32.mrb[21].mxu1 }
 0x10b   :  { %v828_v49 = vmax.f32 %v764_v39, 0.0  ;;  %v860_v50 = vmax.f32 %v796_v40, 0.0  ;;  %v695_v51 = vmul.f32 %v1497_v7, %v449_v47  ;;  %v727_v52 = vmul.f32 %v1497_v7, %v609_v48 }
 0x10c   :  { %893 = vst [vmem:[%s1828_s4 + $0x98] sm:$0xff] %v829_v43  ;;  %925 = vst [vmem:[%s1828_s4 + $0x198] sm:$0xff] %v861_v44  ;;  %v767_v53 = vadd.f32 %v1502_v9, %v696_v45  ;;  %v799_v54 = vadd.f32 %v1502_v9, %v728_v46 }
 0x10d   :  { %892 = vst [vmem:[%s1828_s4 + $0x90] sm:$0xff] %v828_v49  ;;  %924 = vst [vmem:[%s1828_s4 + $0x190] sm:$0xff] %v860_v50  ;;  %v766_v55 = vadd.f32 %v1502_v9, %v695_v51  ;;  %v798_v56 = vadd.f32 %v1502_v9, %v727_v52  ;;  %v1123_v57 = vpop.f32.mrb[22].mxu0  ;;  %v1171_v58 = vpop.f32.mrb[22].mxu1 }
 0x10e   :  { %v831_v59 = vmax.f32 %v767_v53, 0.0  ;;  %v863_v60 = vmax.f32 %v799_v54, 0.0  ;;  %v698_v61 = vmul.f32 %v1123_v57, %v1497_v7  ;;  %v730_v62 = vmul.f32 %v1171_v58, %v1497_v7  ;;  %v459_v63 = vpop.f32.mrb[23].mxu0  ;;  %v619_v0 = vpop.f32.mrb[23].mxu1 }
 0x10f   :  { %v830_v1 = vmax.f32 %v766_v55, 0.0  ;;  %v862_v2 = vmax.f32 %v798_v56, 0.0  ;;  %v697_v3 = vmul.f32 %v1497_v7, %v459_v63  ;;  %v729_v4 = vmul.f32 %v1497_v7, %v619_v0 }
 0x110   :  { %895 = vst [vmem:[%s1828_s4 + $0xa8] sm:$0xff] %v831_v59  ;;  %927 = vst [vmem:[%s1828_s4 + $0x1a8] sm:$0xff] %v863_v60  ;;  %v769_v5 = vadd.f32 %v1502_v9, %v698_v61  ;;  %v801_v6 = vadd.f32 %v1502_v9, %v730_v62 }
 0x111   :  { %894 = vst [vmem:[%s1828_s4 + $0xa0] sm:$0xff] %v830_v1  ;;  %926 = vst [vmem:[%s1828_s4 + $0x1a0] sm:$0xff] %v862_v2  ;;  %v768_v8 = vadd.f32 %v1502_v9, %v697_v3  ;;  %v800_v10 = vadd.f32 %v1502_v9, %v729_v4  ;;  %v1126_v11 = vpop.f32.mrb[24].mxu0  ;;  %v1174_v12 = vpop.f32.mrb[24].mxu1 }
 0x112   :  { %v833_v13 = vmax.f32 %v769_v5, 0.0  ;;  %v865_v14 = vmax.f32 %v801_v6, 0.0  ;;  %v700_v15 = vmul.f32 %v1126_v11, %v1497_v7  ;;  %v732_v16 = vmul.f32 %v1174_v12, %v1497_v7  ;;  %v469_v17 = vpop.f32.mrb[25].mxu0  ;;  %v629_v18 = vpop.f32.mrb[25].mxu1 }
 0x113   :  { %v832_v19 = vmax.f32 %v768_v8, 0.0  ;;  %v864_v20 = vmax.f32 %v800_v10, 0.0  ;;  %v699_v21 = vmul.f32 %v1497_v7, %v469_v17  ;;  %v731_v22 = vmul.f32 %v1497_v7, %v629_v18 }
 0x114   :  { %897 = vst [vmem:[%s1828_s4 + $0xb8] sm:$0xff] %v833_v13  ;;  %929 = vst [vmem:[%s1828_s4 + $0x1b8] sm:$0xff] %v865_v14  ;;  %v771_v23 = vadd.f32 %v1502_v9, %v700_v15  ;;  %v803_v24 = vadd.f32 %v1502_v9, %v732_v16 }
 0x115   :  { %896 = vst [vmem:[%s1828_s4 + $0xb0] sm:$0xff] %v832_v19  ;;  %928 = vst [vmem:[%s1828_s4 + $0x1b0] sm:$0xff] %v864_v20  ;;  %v770_v25 = vadd.f32 %v1502_v9, %v699_v21  ;;  %v802_v26 = vadd.f32 %v1502_v9, %v731_v22  ;;  %v1129_v27 = vpop.f32.mrb[26].mxu0  ;;  %v1177_v28 = vpop.f32.mrb[26].mxu1 }
 0x116   :  { %v835_v29 = vmax.f32 %v771_v23, 0.0  ;;  %v867_v30 = vmax.f32 %v803_v24, 0.0  ;;  %v702_v31 = vmul.f32 %v1129_v27, %v1497_v7  ;;  %v734_v32 = vmul.f32 %v1177_v28, %v1497_v7  ;;  %v479_v33 = vpop.f32.mrb[27].mxu0  ;;  %v639_v34 = vpop.f32.mrb[27].mxu1 }
 0x117   :  { %v834_v35 = vmax.f32 %v770_v25, 0.0  ;;  %v866_v36 = vmax.f32 %v802_v26, 0.0  ;;  %v701_v37 = vmul.f32 %v1497_v7, %v479_v33  ;;  %v733_v38 = vmul.f32 %v1497_v7, %v639_v34 }
 0x118   :  { %899 = vst [vmem:[%s1828_s4 + $0xc8] sm:$0xff] %v835_v29  ;;  %931 = vst [vmem:[%s1828_s4 + $0x1c8] sm:$0xff] %v867_v30  ;;  %v773_v39 = vadd.f32 %v1502_v9, %v702_v31  ;;  %v805_v40 = vadd.f32 %v1502_v9, %v734_v32 }
 0x119   :  { %898 = vst [vmem:[%s1828_s4 + $0xc0] sm:$0xff] %v834_v35  ;;  %930 = vst [vmem:[%s1828_s4 + $0x1c0] sm:$0xff] %v866_v36  ;;  %v772_v41 = vadd.f32 %v1502_v9, %v701_v37  ;;  %v804_v42 = vadd.f32 %v1502_v9, %v733_v38  ;;  %v1132_v43 = vpop.f32.mrb[28].mxu0  ;;  %v1180_v44 = vpop.f32.mrb[28].mxu1 }
 0x11a   :  { %v837_v45 = vmax.f32 %v773_v39, 0.0  ;;  %v869_v46 = vmax.f32 %v805_v40, 0.0  ;;  %v704_v47 = vmul.f32 %v1132_v43, %v1497_v7  ;;  %v736_v48 = vmul.f32 %v1180_v44, %v1497_v7  ;;  %v489_v49 = vpop.f32.mrb[29].mxu0  ;;  %v649_v50 = vpop.f32.mrb[29].mxu1 }
 0x11b   :  { %v836_v51 = vmax.f32 %v772_v41, 0.0  ;;  %v868_v52 = vmax.f32 %v804_v42, 0.0  ;;  %v703_v53 = vmul.f32 %v1497_v7, %v489_v49  ;;  %v735_v54 = vmul.f32 %v1497_v7, %v649_v50 }
 0x11c   :  { %901 = vst [vmem:[%s1828_s4 + $0xd8] sm:$0xff] %v837_v45  ;;  %933 = vst [vmem:[%s1828_s4 + $0x1d8] sm:$0xff] %v869_v46  ;;  %v775_v55 = vadd.f32 %v1502_v9, %v704_v47  ;;  %v807_v56 = vadd.f32 %v1502_v9, %v736_v48 }
 0x11d   :  { %900 = vst [vmem:[%s1828_s4 + $0xd0] sm:$0xff] %v836_v51  ;;  %932 = vst [vmem:[%s1828_s4 + $0x1d0] sm:$0xff] %v868_v52  ;;  %v774_v57 = vadd.f32 %v1502_v9, %v703_v53  ;;  %v806_v58 = vadd.f32 %v1502_v9, %v735_v54  ;;  %v1135_v59 = vpop.f32.mrb[30].mxu0  ;;  %v1183_v60 = vpop.f32.mrb[30].mxu1 }
 0x11e   :  { %v839_v61 = vmax.f32 %v775_v55, 0.0  ;;  %v871_v62 = vmax.f32 %v807_v56, 0.0  ;;  %v706_v63 = vmul.f32 %v1135_v59, %v1497_v7  ;;  %v738_v0 = vmul.f32 %v1183_v60, %v1497_v7  ;;  %v499_v1 = vpop.f32.mrb[31].mxu0  ;;  %v659_v2 = vpop.f32.mrb[31].mxu1 }
 0x11f   :  { %v838_v3 = vmax.f32 %v774_v57, 0.0  ;;  %v870_v4 = vmax.f32 %v806_v58, 0.0  ;;  %v705_v5 = vmul.f32 %v1497_v7, %v499_v1  ;;  %v737_v6 = vmul.f32 %v1497_v7, %v659_v2 }
 0x120   :  { %903 = vst [vmem:[%s1828_s4 + $0xe8] sm:$0xff] %v839_v61  ;;  %935 = vst [vmem:[%s1828_s4 + $0x1e8] sm:$0xff] %v871_v62  ;;  %v777_v8 = vadd.f32 %v1502_v9, %v706_v63  ;;  %v809_v10 = vadd.f32 %v1502_v9, %v738_v0 }
 0x121   :  { %902 = vst [vmem:[%s1828_s4 + $0xe0] sm:$0xff] %v838_v3  ;;  %934 = vst [vmem:[%s1828_s4 + $0x1e0] sm:$0xff] %v870_v4  ;;  %v776_v7 = vadd.f32 %v1502_v9, %v705_v5  ;;  %v808_v11 = vadd.f32 %v1502_v9, %v737_v6 }
 0x122   :  { %v841_v12 = vmax.f32 %v777_v8, 0.0  ;;  %v873_v13 = vmax.f32 %v809_v10, 0.0 }
 0x123   :  { %v840_v14 = vmax.f32 %v776_v7, 0.0  ;;  %v872_v15 = vmax.f32 %v808_v11, 0.0 }
 0x124   :  { %905 = vst [vmem:[%s1828_s4 + $0xf8] sm:$0xff] %v841_v12  ;;  %937 = vst [vmem:[%s1828_s4 + $0x1f8] sm:$0xff] %v873_v13 }
 0x125   :  { %904 = vst [vmem:[%s1828_s4 + $0xf0] sm:$0xff] %v840_v14  ;;  %936 = vst [vmem:[%s1828_s4 + $0x1f0] sm:$0xff] %v872_v15 }

</bundles_post_ra>
